<compile_context>
chip_gen: v6e
topology: v6e:2x2x1
jax: 0.10.0
libtpu: 0.0.40
codegen_flags: <defaults>
</compile_context>

<pallas_src>
import jax
import jax.numpy as jnp
import numpy as np
from jax import lax
from jax.experimental import pallas as pl
from jax.experimental.pallas import tpu as pltpu

EPS = 1e-5


def down_forward(x_nchw, w1_oihw, w2_oihw):
    """Pallas implementation of Down.forward.  Input/output are NCHW like PyTorch."""
    n, cin, H, W = x_nchw.shape
    cmid = w1_oihw.shape[0]
    cout = w2_oihw.shape[0]
    hp, wp = H // 2, W // 2
    M = n * hp * wp                       # flattened (N, Hp, Wp) -> lane axis

    # ---- wrapper-side layout plumbing (pure XLA transposes, no compute) ----
    # 2x2 pool-window-major, channels-on-sublanes, flat-spatial-on-lanes view:
    # (N,C,H,W) -> (N,C,Hp,2,Wp,2) -> (wy,wx,C,N,Hp,Wp) -> (4,C,M)
    xwin = jnp.transpose(
        x_nchw.astype(jnp.float32).reshape(n, cin, hp, 2, wp, 2),
        (3, 5, 1, 0, 2, 4)).reshape(4, cin, M)

    # Conv weights: OIHW -> (Cout, 9*Cin) tap-major matrices, bf16 for the MXU.
    # Column (ky*3+kx)*Cin + i  pairs with patch row  k*Cin + i.
    w1 = jnp.transpose(w1_oihw, (0, 2, 3, 1)).reshape(cmid, 9 * cin).astype(jnp.bfloat16)
    w2 = jnp.transpose(w2_oihw, (0, 2, 3, 1)).reshape(cout, 9 * cmid).astype(jnp.bfloat16)

    # Static per-tap lane shifts + 0/1 border masks ("SAME" padding by masking
    # border taps -- no padded copies are ever materialized).
    ys = np.tile(np.repeat(np.arange(hp), wp), n)      # y coord of each flat index
    xs = np.tile(np.arange(wp), n * hp)                # x coord of each flat index
    shifts = []
    masks_np = np.ones((9, 1, M), np.float32)
    for ky in range(3):
        for kx in range(3):
            dy, dx = ky - 1, kx - 1
            k = ky * 3 + kx
            # tap[m] = act[m + dy*wp + dx]  ==  roll by shift = -(dy*wp + dx)
            shifts.append(int((-(dy * wp + dx)) % M))
            valid = ((ys + dy >= 0) & (ys + dy < hp) &
                     (xs + dx >= 0) & (xs + dx < wp))
            masks_np[k, 0, :] = valid.astype(np.float32)
    masks = jnp.asarray(masks_np)

    inv_m = 1.0 / float(M)

    def kernel(xwin_ref, mask_ref, w1_ref, w2_ref, o_ref):
        # MaxPool2d(2): elementwise max of the 4 window taps, lane-dense (Cin, M).
        pooled = jnp.maximum(jnp.maximum(xwin_ref[0], xwin_ref[1]),
                             jnp.maximum(xwin_ref[2], xwin_ref[3]))

        def conv3x3(act, w_ref):
            # im2col via lane-roll + border mask; single MXU matmul, f32 accumulate.
            taps = []
            for k in range(9):
                if k == 4:                                   # center tap: no shift, no mask
                    taps.append(act)
                else:
                    t = pltpu.roll(act, shifts[k], axis=1)   # XLU lane rotation
                    taps.append(t * mask_ref[k])             # (1, M) 0/1 border mask
            patches = jnp.concatenate(taps, axis=0).astype(jnp.bfloat16)   # (9*C, M)
            return jnp.dot(w_ref[...], patches,
                           preferred_element_type=jnp.float32)             # (Co, M) f32

        def bn_relu(y):
            # BatchNorm2d training-mode batch stats over (N,H,W) == the lane axis,
            # single pass (sum & sum-of-squares), biased variance, gamma=1/beta=0.
            mean = jnp.sum(y, axis=1, keepdims=True) * inv_m
            var = jnp.sum(y * y, axis=1, keepdims=True) * inv_m - mean * mean
            var = jnp.maximum(var, 0.0)
            return jnp.maximum((y - mean) * lax.rsqrt(var + EPS), 0.0)

        h = bn_relu(conv3x3(pooled, w1_ref))      # (Cmid, M)
        h = bn_relu(conv3x3(h, w2_ref))           # (Cout, M)
        o_ref[...] = h                            # lane-dense store

    # VMEM budget sized to the actual working set (with generous headroom).
    act_bytes = 4 * M * (cin + cmid + cout)
    patch_bytes = 2 * M * 9 * (cin + cmid)
    io_bytes = 4 * (xwin.size + masks.size + cout * M) + 2 * (w1.size + w2.size)
    vmem_bytes = int(min(100 * 2**20,
                         max(16 * 2**20, 4 * (act_bytes + patch_bytes + io_bytes))))

    out_cm = pl.pallas_call(
        kernel,
        out_shape=jax.ShapeDtypeStruct((cout, M), jnp.float32),
        in_specs=[pl.BlockSpec(memory_space=pltpu.MemorySpace.VMEM)] * 4,
        out_specs=pl.BlockSpec(memory_space=pltpu.MemorySpace.VMEM),
        compiler_params=pltpu.CompilerParams(vmem_limit_bytes=vmem_bytes),
    )(xwin, masks, w1, w2)

    # (Cout, N*Hp*Wp) -> NCHW
    return out_cm.reshape(cout, n, hp, wp).transpose(1, 0, 2, 3)


def down_reference(x_nchw, w1_oihw, w2_oihw):
    """Pure-JAX reference mirroring the PyTorch forward (for validation)."""
    p = lax.reduce_window(x_nchw, -jnp.inf, lax.max,
                          (1, 1, 2, 2), (1, 1, 2, 2), 'VALID')

    def conv_bn_relu(h, w):
        y = lax.conv_general_dilated(
            h, w, (1, 1), 'SAME',
            dimension_numbers=('NCHW', 'OIHW', 'NCHW'),
            precision=lax.Precision.HIGHEST)
        mean = jnp.mean(y, axis=(0, 2, 3), keepdims=True)
        var = jnp.mean((y - mean) ** 2, axis=(0, 2, 3), keepdims=True)
        return jnp.maximum((y - mean) * lax.rsqrt(var + EPS), 0.0)

    return conv_bn_relu(conv_bn_relu(p, w1_oihw), w2_oihw)


if __name__ == "__main__":
    # Down(in_channels=4, out_channels=8) at small shapes.
    N, C_IN, H, W = 2, 4, 16, 16
    C_MID = 8   # DoubleConv default: mid_channels = out_channels
    C_OUT = 8

    key = jax.random.PRNGKey(0)
    kx, k1, k2 = jax.random.split(key, 3)

    x = jax.random.normal(kx, (N, C_IN, H, W), dtype=jnp.float32)
    # Deterministic synthetic conv weights in PyTorch OIHW layout (kaiming-ish scale).
    w1 = jax.random.normal(k1, (C_MID, C_IN, 3, 3), dtype=jnp.float32) * (1.0 / (C_IN * 9)) ** 0.5
    w2 = jax.random.normal(k2, (C_OUT, C_MID, 3, 3), dtype=jnp.float32) * (1.0 / (C_MID * 9)) ** 0.5

    out = jax.block_until_ready(down_forward(x, w1, w2))
    ref = jax.block_until_ready(down_reference(x, w1, w2))

    assert out.shape == (N, C_OUT, H // 2, W // 2), out.shape
    # Tolerance accounts for bf16 MXU operands (f32 accumulation) vs. the f32
    # HIGHEST-precision reference, through two convs + batch-norm.
    np.testing.assert_allclose(np.asarray(out), np.asarray(ref), atol=2e-2, rtol=2e-2)

    print("KERNEL_OK")
</pallas_src>

<mosaic_0001>
module attributes {stable_mosaic.version = 11 : i64} {
  func.func @kernel(%arg0: memref<4x4x128xf32, #tpu.memory_space<vmem>>, %arg1: memref<9x1x128xf32, #tpu.memory_space<vmem>>, %arg2: memref<8x36xbf16, #tpu.memory_space<vmem>>, %arg3: memref<8x72xbf16, #tpu.memory_space<vmem>>, %arg4: memref<8x128xf32, #tpu.memory_space<vmem>>) attributes {dimension_semantics = [], scalar_prefetch = 0 : i64, scratch_operands = 0 : i64, tpu.core_type = #tpu.core_type<tc>} {
    %c0 = arith.constant 0 : index
    %c0_0 = arith.constant 0 : index
    %c0_1 = arith.constant 0 : index
    %0 = vector.load %arg0[%c0, %c0_0, %c0_1] : memref<4x4x128xf32, #tpu.memory_space<vmem>>, vector<1x4x128xf32>
    %1 = vector.shape_cast %0 : vector<1x4x128xf32> to vector<4x128xf32>
    %c1 = arith.constant 1 : index
    %c0_2 = arith.constant 0 : index
    %c0_3 = arith.constant 0 : index
    %2 = vector.load %arg0[%c1, %c0_2, %c0_3] : memref<4x4x128xf32, #tpu.memory_space<vmem>>, vector<1x4x128xf32>
    %3 = vector.shape_cast %2 : vector<1x4x128xf32> to vector<4x128xf32>
    %4 = arith.maximumf %1, %3 : vector<4x128xf32>
    %c2 = arith.constant 2 : index
    %c0_4 = arith.constant 0 : index
    %c0_5 = arith.constant 0 : index
    %5 = vector.load %arg0[%c2, %c0_4, %c0_5] : memref<4x4x128xf32, #tpu.memory_space<vmem>>, vector<1x4x128xf32>
    %6 = vector.shape_cast %5 : vector<1x4x128xf32> to vector<4x128xf32>
    %c3 = arith.constant 3 : index
    %c0_6 = arith.constant 0 : index
    %c0_7 = arith.constant 0 : index
    %7 = vector.load %arg0[%c3, %c0_6, %c0_7] : memref<4x4x128xf32, #tpu.memory_space<vmem>>, vector<1x4x128xf32>
    %8 = vector.shape_cast %7 : vector<1x4x128xf32> to vector<4x128xf32>
    %9 = arith.maximumf %6, %8 : vector<4x128xf32>
    %10 = arith.maximumf %4, %9 : vector<4x128xf32>
    %c9_i32 = arith.constant 9 : i32
    %11 = tpu.dynamic_rotate %10 by %c9_i32 dim 1 : vector<4x128xf32>, i32 -> vector<4x128xf32>
    %c0_8 = arith.constant 0 : index
    %c0_9 = arith.constant 0 : index
    %c0_10 = arith.constant 0 : index
    %12 = vector.load %arg1[%c0_8, %c0_9, %c0_10] : memref<9x1x128xf32, #tpu.memory_space<vmem>>, vector<1x1x128xf32>
    %13 = vector.shape_cast %12 : vector<1x1x128xf32> to vector<1x128xf32>
    %14 = vector.broadcast %13 : vector<1x128xf32> to vector<4x128xf32>
    %15 = arith.mulf %11, %14 : vector<4x128xf32>
    %c8_i32 = arith.constant 8 : i32
    %16 = tpu.dynamic_rotate %10 by %c8_i32 dim 1 : vector<4x128xf32>, i32 -> vector<4x128xf32>
    %c1_11 = arith.constant 1 : index
    %c0_12 = arith.constant 0 : index
    %c0_13 = arith.constant 0 : index
    %17 = vector.load %arg1[%c1_11, %c0_12, %c0_13] : memref<9x1x128xf32, #tpu.memory_space<vmem>>, vector<1x1x128xf32>
    %18 = vector.shape_cast %17 : vector<1x1x128xf32> to vector<1x128xf32>
    %19 = vector.broadcast %18 : vector<1x128xf32> to vector<4x128xf32>
    %20 = arith.mulf %16, %19 : vector<4x128xf32>
    %c7_i32 = arith.constant 7 : i32
    %21 = tpu.dynamic_rotate %10 by %c7_i32 dim 1 : vector<4x128xf32>, i32 -> vector<4x128xf32>
    %c2_14 = arith.constant 2 : index
    %c0_15 = arith.constant 0 : index
    %c0_16 = arith.constant 0 : index
    %22 = vector.load %arg1[%c2_14, %c0_15, %c0_16] : memref<9x1x128xf32, #tpu.memory_space<vmem>>, vector<1x1x128xf32>
    %23 = vector.shape_cast %22 : vector<1x1x128xf32> to vector<1x128xf32>
    %24 = vector.broadcast %23 : vector<1x128xf32> to vector<4x128xf32>
    %25 = arith.mulf %21, %24 : vector<4x128xf32>
    %c1_i32 = arith.constant 1 : i32
    %26 = tpu.dynamic_rotate %10 by %c1_i32 dim 1 : vector<4x128xf32>, i32 -> vector<4x128xf32>
    %c3_17 = arith.constant 3 : index
    %c0_18 = arith.constant 0 : index
    %c0_19 = arith.constant 0 : index
    %27 = vector.load %arg1[%c3_17, %c0_18, %c0_19] : memref<9x1x128xf32, #tpu.memory_space<vmem>>, vector<1x1x128xf32>
    %28 = vector.shape_cast %27 : vector<1x1x128xf32> to vector<1x128xf32>
    %29 = vector.broadcast %28 : vector<1x128xf32> to vector<4x128xf32>
    %30 = arith.mulf %26, %29 : vector<4x128xf32>
    %c127_i32 = arith.constant 127 : i32
    %31 = tpu.dynamic_rotate %10 by %c127_i32 dim 1 : vector<4x128xf32>, i32 -> vector<4x128xf32>
    %c5 = arith.constant 5 : index
    %c0_20 = arith.constant 0 : index
    %c0_21 = arith.constant 0 : index
    %32 = vector.load %arg1[%c5, %c0_20, %c0_21] : memref<9x1x128xf32, #tpu.memory_space<vmem>>, vector<1x1x128xf32>
    %33 = vector.shape_cast %32 : vector<1x1x128xf32> to vector<1x128xf32>
    %34 = vector.broadcast %33 : vector<1x128xf32> to vector<4x128xf32>
    %35 = arith.mulf %31, %34 : vector<4x128xf32>
    %c121_i32 = arith.constant 121 : i32
    %36 = tpu.dynamic_rotate %10 by %c121_i32 dim 1 : vector<4x128xf32>, i32 -> vector<4x128xf32>
    %c6 = arith.constant 6 : index
    %c0_22 = arith.constant 0 : index
    %c0_23 = arith.constant 0 : index
    %37 = vector.load %arg1[%c6, %c0_22, %c0_23] : memref<9x1x128xf32, #tpu.memory_space<vmem>>, vector<1x1x128xf32>
    %38 = vector.shape_cast %37 : vector<1x1x128xf32> to vector<1x128xf32>
    %39 = vector.broadcast %38 : vector<1x128xf32> to vector<4x128xf32>
    %40 = arith.mulf %36, %39 : vector<4x128xf32>
    %c120_i32 = arith.constant 120 : i32
    %41 = tpu.dynamic_rotate %10 by %c120_i32 dim 1 : vector<4x128xf32>, i32 -> vector<4x128xf32>
    %c7 = arith.constant 7 : index
    %c0_24 = arith.constant 0 : index
    %c0_25 = arith.constant 0 : index
    %42 = vector.load %arg1[%c7, %c0_24, %c0_25] : memref<9x1x128xf32, #tpu.memory_space<vmem>>, vector<1x1x128xf32>
    %43 = vector.shape_cast %42 : vector<1x1x128xf32> to vector<1x128xf32>
    %44 = vector.broadcast %43 : vector<1x128xf32> to vector<4x128xf32>
    %45 = arith.mulf %41, %44 : vector<4x128xf32>
    %c119_i32 = arith.constant 119 : i32
    %46 = tpu.dynamic_rotate %10 by %c119_i32 dim 1 : vector<4x128xf32>, i32 -> vector<4x128xf32>
    %c8 = arith.constant 8 : index
    %c0_26 = arith.constant 0 : index
    %c0_27 = arith.constant 0 : index
    %47 = vector.load %arg1[%c8, %c0_26, %c0_27] : memref<9x1x128xf32, #tpu.memory_space<vmem>>, vector<1x1x128xf32>
    %48 = vector.shape_cast %47 : vector<1x1x128xf32> to vector<1x128xf32>
    %49 = vector.broadcast %48 : vector<1x128xf32> to vector<4x128xf32>
    %50 = arith.mulf %46, %49 : vector<4x128xf32>
    %51 = tpu.concatenate %15, %20, %25, %30, %10, %35, %40, %45, %50 in 0 : vector<4x128xf32>, vector<4x128xf32>, vector<4x128xf32>, vector<4x128xf32>, vector<4x128xf32>, vector<4x128xf32>, vector<4x128xf32>, vector<4x128xf32>, vector<4x128xf32> -> vector<36x128xf32>
    %52 = arith.truncf %51 : vector<36x128xf32> to vector<36x128xbf16>
    %c0_28 = arith.constant 0 : index
    %c0_29 = arith.constant 0 : index
    %53 = vector.load %arg2[%c0_28, %c0_29] : memref<8x36xbf16, #tpu.memory_space<vmem>>, vector<8x36xbf16>
    %cst = arith.constant dense<0.000000e+00> : vector<8x128xf32>
    %54 = tpu.matmul %53, %52, %cst {dimension_numbers = #tpu.dot_dimension_numbers<[1], [0], [0], [1], [0, 0, 1, 1], [], []>} : vector<8x36xbf16>, vector<36x128xbf16>, vector<8x128xf32> -> vector<8x128xf32>
    %cst_30 = arith.constant dense<0.000000e+00> : vector<8xf32>
    %55 = vector.multi_reduction <add>, %54, %cst_30 [1] : vector<8x128xf32> to vector<8xf32>
    %56 = vector.shape_cast %55 : vector<8xf32> to vector<8x1xf32>
    %cst_31 = arith.constant 7.812500e-03 : f32
    %57 = vector.broadcast %cst_31 : f32 to vector<8x1xf32>
    %58 = arith.mulf %56, %57 : vector<8x1xf32>
    %59 = arith.mulf %54, %54 : vector<8x128xf32>
    %cst_32 = arith.constant dense<0.000000e+00> : vector<8xf32>
    %60 = vector.multi_reduction <add>, %59, %cst_32 [1] : vector<8x128xf32> to vector<8xf32>
    %61 = vector.shape_cast %60 : vector<8xf32> to vector<8x1xf32>
    %cst_33 = arith.constant 7.812500e-03 : f32
    %62 = vector.broadcast %cst_33 : f32 to vector<8x1xf32>
    %63 = arith.mulf %61, %62 : vector<8x1xf32>
    %64 = arith.mulf %58, %58 : vector<8x1xf32>
    %65 = arith.subf %63, %64 : vector<8x1xf32>
    %cst_34 = arith.constant 0.000000e+00 : f32
    %66 = vector.broadcast %cst_34 : f32 to vector<8x1xf32>
    %67 = arith.maximumf %65, %66 : vector<8x1xf32>
    %68 = vector.broadcast %58 : vector<8x1xf32> to vector<8x128xf32>
    %69 = arith.subf %54, %68 : vector<8x128xf32>
    %cst_35 = arith.constant 9.99999974E-6 : f32
    %70 = vector.broadcast %cst_35 : f32 to vector<8x1xf32>
    %71 = arith.addf %67, %70 : vector<8x1xf32>
    %72 = math.rsqrt %71 : vector<8x1xf32>
    %73 = vector.broadcast %72 : vector<8x1xf32> to vector<8x128xf32>
    %74 = arith.mulf %69, %73 : vector<8x128xf32>
    %cst_36 = arith.constant 0.000000e+00 : f32
    %75 = vector.broadcast %cst_36 : f32 to vector<8x128xf32>
    %76 = arith.maximumf %74, %75 : vector<8x128xf32>
    %c9_i32_37 = arith.constant 9 : i32
    %77 = tpu.dynamic_rotate %76 by %c9_i32_37 dim 1 : vector<8x128xf32>, i32 -> vector<8x128xf32>
    %c0_38 = arith.constant 0 : index
    %c0_39 = arith.constant 0 : index
    %c0_40 = arith.constant 0 : index
    %78 = vector.load %arg1[%c0_38, %c0_39, %c0_40] : memref<9x1x128xf32, #tpu.memory_space<vmem>>, vector<1x1x128xf32>
    %79 = vector.shape_cast %78 : vector<1x1x128xf32> to vector<1x128xf32>
    %80 = vector.broadcast %79 : vector<1x128xf32> to vector<8x128xf32>
    %81 = arith.mulf %77, %80 : vector<8x128xf32>
    %c8_i32_41 = arith.constant 8 : i32
    %82 = tpu.dynamic_rotate %76 by %c8_i32_41 dim 1 : vector<8x128xf32>, i32 -> vector<8x128xf32>
    %c1_42 = arith.constant 1 : index
    %c0_43 = arith.constant 0 : index
    %c0_44 = arith.constant 0 : index
    %83 = vector.load %arg1[%c1_42, %c0_43, %c0_44] : memref<9x1x128xf32, #tpu.memory_space<vmem>>, vector<1x1x128xf32>
    %84 = vector.shape_cast %83 : vector<1x1x128xf32> to vector<1x128xf32>
    %85 = vector.broadcast %84 : vector<1x128xf32> to vector<8x128xf32>
    %86 = arith.mulf %82, %85 : vector<8x128xf32>
    %c7_i32_45 = arith.constant 7 : i32
    %87 = tpu.dynamic_rotate %76 by %c7_i32_45 dim 1 : vector<8x128xf32>, i32 -> vector<8x128xf32>
    %c2_46 = arith.constant 2 : index
    %c0_47 = arith.constant 0 : index
    %c0_48 = arith.constant 0 : index
    %88 = vector.load %arg1[%c2_46, %c0_47, %c0_48] : memref<9x1x128xf32, #tpu.memory_space<vmem>>, vector<1x1x128xf32>
    %89 = vector.shape_cast %88 : vector<1x1x128xf32> to vector<1x128xf32>
    %90 = vector.broadcast %89 : vector<1x128xf32> to vector<8x128xf32>
    %91 = arith.mulf %87, %90 : vector<8x128xf32>
    %c1_i32_49 = arith.constant 1 : i32
    %92 = tpu.dynamic_rotate %76 by %c1_i32_49 dim 1 : vector<8x128xf32>, i32 -> vector<8x128xf32>
    %c3_50 = arith.constant 3 : index
    %c0_51 = arith.constant 0 : index
    %c0_52 = arith.constant 0 : index
    %93 = vector.load %arg1[%c3_50, %c0_51, %c0_52] : memref<9x1x128xf32, #tpu.memory_space<vmem>>, vector<1x1x128xf32>
    %94 = vector.shape_cast %93 : vector<1x1x128xf32> to vector<1x128xf32>
    %95 = vector.broadcast %94 : vector<1x128xf32> to vector<8x128xf32>
    %96 = arith.mulf %92, %95 : vector<8x128xf32>
    %c127_i32_53 = arith.constant 127 : i32
    %97 = tpu.dynamic_rotate %76 by %c127_i32_53 dim 1 : vector<8x128xf32>, i32 -> vector<8x128xf32>
    %c5_54 = arith.constant 5 : index
    %c0_55 = arith.constant 0 : index
    %c0_56 = arith.constant 0 : index
    %98 = vector.load %arg1[%c5_54, %c0_55, %c0_56] : memref<9x1x128xf32, #tpu.memory_space<vmem>>, vector<1x1x128xf32>
    %99 = vector.shape_cast %98 : vector<1x1x128xf32> to vector<1x128xf32>
    %100 = vector.broadcast %99 : vector<1x128xf32> to vector<8x128xf32>
    %101 = arith.mulf %97, %100 : vector<8x128xf32>
    %c121_i32_57 = arith.constant 121 : i32
    %102 = tpu.dynamic_rotate %76 by %c121_i32_57 dim 1 : vector<8x128xf32>, i32 -> vector<8x128xf32>
    %c6_58 = arith.constant 6 : index
    %c0_59 = arith.constant 0 : index
    %c0_60 = arith.constant 0 : index
    %103 = vector.load %arg1[%c6_58, %c0_59, %c0_60] : memref<9x1x128xf32, #tpu.memory_space<vmem>>, vector<1x1x128xf32>
    %104 = vector.shape_cast %103 : vector<1x1x128xf32> to vector<1x128xf32>
    %105 = vector.broadcast %104 : vector<1x128xf32> to vector<8x128xf32>
    %106 = arith.mulf %102, %105 : vector<8x128xf32>
    %c120_i32_61 = arith.constant 120 : i32
    %107 = tpu.dynamic_rotate %76 by %c120_i32_61 dim 1 : vector<8x128xf32>, i32 -> vector<8x128xf32>
    %c7_62 = arith.constant 7 : index
    %c0_63 = arith.constant 0 : index
    %c0_64 = arith.constant 0 : index
    %108 = vector.load %arg1[%c7_62, %c0_63, %c0_64] : memref<9x1x128xf32, #tpu.memory_space<vmem>>, vector<1x1x128xf32>
    %109 = vector.shape_cast %108 : vector<1x1x128xf32> to vector<1x128xf32>
    %110 = vector.broadcast %109 : vector<1x128xf32> to vector<8x128xf32>
    %111 = arith.mulf %107, %110 : vector<8x128xf32>
    %c119_i32_65 = arith.constant 119 : i32
    %112 = tpu.dynamic_rotate %76 by %c119_i32_65 dim 1 : vector<8x128xf32>, i32 -> vector<8x128xf32>
    %c8_66 = arith.constant 8 : index
    %c0_67 = arith.constant 0 : index
    %c0_68 = arith.constant 0 : index
    %113 = vector.load %arg1[%c8_66, %c0_67, %c0_68] : memref<9x1x128xf32, #tpu.memory_space<vmem>>, vector<1x1x128xf32>
    %114 = vector.shape_cast %113 : vector<1x1x128xf32> to vector<1x128xf32>
    %115 = vector.broadcast %114 : vector<1x128xf32> to vector<8x128xf32>
    %116 = arith.mulf %112, %115 : vector<8x128xf32>
    %117 = tpu.concatenate %81, %86, %91, %96, %76, %101, %106, %111, %116 in 0 : vector<8x128xf32>, vector<8x128xf32>, vector<8x128xf32>, vector<8x128xf32>, vector<8x128xf32>, vector<8x128xf32>, vector<8x128xf32>, vector<8x128xf32>, vector<8x128xf32> -> vector<72x128xf32>
    %118 = arith.truncf %117 : vector<72x128xf32> to vector<72x128xbf16>
    %c0_69 = arith.constant 0 : index
    %c0_70 = arith.constant 0 : index
    %119 = vector.load %arg3[%c0_69, %c0_70] : memref<8x72xbf16, #tpu.memory_space<vmem>>, vector<8x72xbf16>
    %cst_71 = arith.constant dense<0.000000e+00> : vector<8x128xf32>
    %120 = tpu.matmul %119, %118, %cst_71 {dimension_numbers = #tpu.dot_dimension_numbers<[1], [0], [0], [1], [0, 0, 1, 1], [], []>} : vector<8x72xbf16>, vector<72x128xbf16>, vector<8x128xf32> -> vector<8x128xf32>
    %cst_72 = arith.constant dense<0.000000e+00> : vector<8xf32>
    %121 = vector.multi_reduction <add>, %120, %cst_72 [1] : vector<8x128xf32> to vector<8xf32>
    %122 = vector.shape_cast %121 : vector<8xf32> to vector<8x1xf32>
    %cst_73 = arith.constant 7.812500e-03 : f32
    %123 = vector.broadcast %cst_73 : f32 to vector<8x1xf32>
    %124 = arith.mulf %122, %123 : vector<8x1xf32>
    %125 = arith.mulf %120, %120 : vector<8x128xf32>
    %cst_74 = arith.constant dense<0.000000e+00> : vector<8xf32>
    %126 = vector.multi_reduction <add>, %125, %cst_74 [1] : vector<8x128xf32> to vector<8xf32>
    %127 = vector.shape_cast %126 : vector<8xf32> to vector<8x1xf32>
    %cst_75 = arith.constant 7.812500e-03 : f32
    %128 = vector.broadcast %cst_75 : f32 to vector<8x1xf32>
    %129 = arith.mulf %127, %128 : vector<8x1xf32>
    %130 = arith.mulf %124, %124 : vector<8x1xf32>
    %131 = arith.subf %129, %130 : vector<8x1xf32>
    %cst_76 = arith.constant 0.000000e+00 : f32
    %132 = vector.broadcast %cst_76 : f32 to vector<8x1xf32>
    %133 = arith.maximumf %131, %132 : vector<8x1xf32>
    %134 = vector.broadcast %124 : vector<8x1xf32> to vector<8x128xf32>
    %135 = arith.subf %120, %134 : vector<8x128xf32>
    %cst_77 = arith.constant 9.99999974E-6 : f32
    %136 = vector.broadcast %cst_77 : f32 to vector<8x1xf32>
    %137 = arith.addf %133, %136 : vector<8x1xf32>
    %138 = math.rsqrt %137 : vector<8x1xf32>
    %139 = vector.broadcast %138 : vector<8x1xf32> to vector<8x128xf32>
    %140 = arith.mulf %135, %139 : vector<8x128xf32>
    %cst_78 = arith.constant 0.000000e+00 : f32
    %141 = vector.broadcast %cst_78 : f32 to vector<8x128xf32>
    %142 = arith.maximumf %140, %141 : vector<8x128xf32>
    %c0_79 = arith.constant 0 : index
    %c0_80 = arith.constant 0 : index
    %143 = vector.load %arg4[%c0_79, %c0_80] : memref<8x128xf32, #tpu.memory_space<vmem>>, vector<8x128xf32>
    tpu.vector_store %arg4[%c0_79, %c0_80], %142 {strides = array<i32>} : memref<8x128xf32, #tpu.memory_space<vmem>>, vector<8x128xf32>,
    return
  }
}

</mosaic_0001>

<bundles_post_ra>
// kernel: tpu_custom_call.1
= control target key start
LH: loop header
LB: loop body
LE: loop exit
PB: predicated region body
PF: predicated region fallthrough
CT: control target
= control target key end

     0   :  { %9 = vsyncpa [#allocation3], 0  ;;  %s620_s0 = inlined_call_operand.hbm [shape: f32[4,4,128], index: 0, kind: input, shape index: {}]   ;;  %s621_s1 = inlined_call_operand.hbm [shape: f32[9,1,128], index: 1, kind: input, shape index: {}]   ;;  %s622_s2 = inlined_call_operand.hbm [shape: bf16[8,36], index: 2, kind: input, shape index: {}]   ;;  %s623_s3 = inlined_call_operand.vmem [shape: bf16[8,72], index: 3, kind: input, shape index: {}]   ;;  %s624_s4 = inlined_call_operand.hbm [shape: f32[8,128], index: 4, kind: output, shape index: {}]  }
   0x1   :  { %10 = vsyncpa [#allocation6], 0 }
   0x2   :  { %11 = vsyncpa [#allocation4], 0  ;;  %s499_s15 = smov [#allocation5]  }
   0x3   :  { %s29_s16 = sshll.u32 %s499_s15, 4  ;;  %s30_s16 = int_to_ptr.vmem [resolvable:$true] %s29_s16 }
   0x4   :  { %s421_s17 = scalar_lea.vmem %s30_s16, 144  ;;  %s425_s18 = scalar_lea.vmem %s30_s16, 160 }
   0x5   :  { %p422_p0 = scmp.ne.s32.totalorder %s30_s16, %s421_s17  ;;  %p426_p1 = scmp.lt.s32.totalorder %s30_s16, %s30_s16 }
   0x6   :  { %p427_p2 = scmp.lt.s32.totalorder %s425_s18, %s421_s17 }
   0x8   :  { %p428_p3 = por %p427_p2, %p426_p1 }
   0xa   :  { %p429_p4 = pnand %p428_p3, %p422_p0 }
   0xc   :  { %432 = shalt.err (!%p429_p4)
}
   0xd   :  { %s500_s19 = smov 16   ;;  %s501_s20 = smov 1  }
   0xe   :  { %35 = dma.hbm_to_vmem [thread:$0]  %s621_s1, 144, %s30_s16, [#allocation6], %s500_s19, %s500_s19, %s501_s20  }
   0xf   :  { %s502_s23 = smov [#allocation2]  }
  0x10   :  { %s17_s24 = sshll.u32 %s502_s23, 4  ;;  %s18_s24 = int_to_ptr.vmem [resolvable:$true] %s17_s24 }
  0x11   :  { %s441_s25 = scalar_lea.vmem %s18_s24, 256  ;;  %p446_p6 = scmp.lt.s32.totalorder %s18_s24, %s18_s24 }
  0x12   :  { %p442_p5 = scmp.ne.s32.totalorder %s18_s24, %s441_s25  ;;  %p447_p7 = scmp.lt.s32.totalorder %s441_s25, %s441_s25 }
  0x14   :  { %p448_p8 = por %p447_p7, %p446_p6 }
  0x16   :  { %p449_p9 = pnand %p448_p8, %p442_p5 }
  0x18   :  { %452 = shalt.err (!%p449_p9)
}
  0x19   :  { %s503_s26 = smov 64   ;;  %s504_s27 = smov 4  }
  0x1a   :  { %23 = dma.hbm_to_vmem [thread:$0]  %s620_s0, 256, %s18_s24, [#allocation3], %s503_s26, %s503_s26, %s504_s27  }
  0x1b   :  { %s505_s30 = smov [#allocation7]  }
  0x1c   :  { %s42_s5 = sshll.u32 %s505_s30, 4  ;;  %s43_s5 = int_to_ptr.vmem [resolvable:$true] %s42_s5 }
  0x1d   :  { %s461_s1 = scalar_lea.vmem %s43_s5, 64  ;;  %p466_p11 = scmp.lt.s32.totalorder %s43_s5, %s43_s5 }
  0x1e   :  { %p462_p10 = scmp.ne.s32.totalorder %s43_s5, %s461_s1  ;;  %p467_p12 = scmp.lt.s32.totalorder %s461_s1, %s461_s1 }
  0x20   :  { %p468_p13 = por %p467_p12, %p466_p11 }
  0x22   :  { %p469_p0 = pnand %p468_p13, %p462_p10 }
  0x24   :  { %472 = shalt.err (!%p469_p0)
}
  0x25   :  { %45 = dma.hbm_to_vmem [thread:$0]  %s622_s2, 64, %s43_s5, [#allocation6]  }
  0x26   :  { %493 = dma.done.wait [#allocation3], 256  }
  0x27   :  { %494 = vsyncadd [#allocation3], 4294967040 }
  0x28   :  { %495 = dma.done.wait [#allocation6], 208  }
  0x29   :  { %496 = vsyncadd [#allocation6], 4294967088  ;;  %v506_v0 = vmov 0.0   ;;  %v58_v1 = vld [vmem:[#allocation2] sm:$0xf]  ;;  %s507_s0 = smov 120  }
  0x2a   :  { %368 = vmatprep.subr.bf16.mxu0 %v506_v0  ;;  %378 = vmatprep.subr.bf16.mxu1 %v506_v0  ;;  %v60_v2 = vld [vmem:[#allocation2 + $0x4] sm:$0xf]  ;;  %v63_v3 = vld [vmem:[#allocation2 + $0x8] sm:$0xf]  ;;  %v65_v5 = vld [vmem:[#allocation2 + $0xc] sm:$0xf] }
  0x2b   :  { %v61_v4 = vmax.f32 %v58_v1, %v60_v2  ;;  %v66_v6 = vmax.f32 %v63_v3, %v65_v5  ;;  %s508_s2 = smov 119   ;;  %s509_s8 = smov 121   ;;  %vm511_vm0 = vmmov 0   ;;  %v563_v8 = vld [vmem:[#allocation5 + $0x8] ss:$0 sm:$0xff]  ;;  %vm180_vm1 = vcmask 1041408  }
  0x2c   :  { %s510_s9 = smov 127   ;;  %374 = vmatprep.mubr.msk.bf16.mxu0 %vm511_vm0, %v506_v0  ;;  %388 = vmatprep.mubr.msk.bf16.mxu1 %vm511_vm0, %v506_v0  ;;  %s512_s10 = smov 8   ;;  %v565_v9 = vld [vmem:[#allocation5 + $0x7] ss:$0 sm:$0xff]  ;;  %v568_v13 = vld [vmem:[#allocation5 + $0x6] ss:$0 sm:$0xff] }
  0x2d   :  { %v67_v7 = vmax.f32 %v61_v4, %v66_v6  ;;  %s513_s11 = smov 7   ;;  %s514_s12 = smov 9   ;;  %v570_v14 = vld [vmem:[#allocation5 + $0x5] ss:$0 sm:$0xff]  ;;  %v575_v22 = vld [vmem:[#allocation5 + $0x3] ss:$0 sm:$0xff] }
  0x2e   :  { %v577_v23 = vld [vmem:[#allocation5 + $0x1] ss:$0 sm:$0xff]  ;;  %vm167_vm2 = vcmask 1043456   ;;  %v584_v32 = vld [vmem:[#allocation5 + $0x2] ss:$0 sm:$0xff]  ;;  %vm176_vm3 = vcmask 293888  }
  0x2f   :  { %133 = vrot.lane.b32.xlu1 %v67_v7, %s507_s0  ;;  %144 = vrot.lane.b32.xlu0 %v67_v7, %s508_s2  ;;  %v586_v34 = vld [vmem:[#allocation5] ss:$0 sm:$0xff]  ;;  %v175_v44 = vld [vmem:[#allocation7] sm:$0xf]  ;;  %vm269_vm4 = vcmask 588800  }
  0x33   :  { %122 = vrot.lane.b32.xlu1 %v67_v7, %s509_s8  ;;  %111 = vrot.lane.b32.xlu0 %v67_v7, %s510_s9 }
  0x37   :  { %100 = vrot.lane.b32.xlu1 %v67_v7, %s501_s20  ;;  %78 = vrot.lane.b32.xlu0 %v67_v7, %s512_s10 }
  0x3b   :  { %89 = vrot.lane.b32.xlu1 %v67_v7, %s513_s11  ;;  %68 = vrot.lane.b32.xlu0 %v67_v7, %s514_s12 }
  0xa1   :  { %v134_v10 = vpop.permute.xlu1 %133  ;;  %v145_v11 = vpop.permute.xlu0 %144 }
  0xa2   :  { %v154_v12 = vmul.f32 %v563_v8, %v145_v11  ;;  %v143_v15 = vmul.f32 %v565_v9, %v134_v10 }
  0xa4   :  { %v174_v16 = vpack.c.bf16 %v154_v12, %v154_v12  ;;  %v165_v24 = vrot.slane %v143_v15, 4 }
  0xa5   :  { %v123_v17 = vpop.permute.xlu1 %122  ;;  %v112_v18 = vpop.permute.xlu0 %111 }
  0xa6   :  { %v132_v19 = vmul.f32 %v568_v13, %v123_v17  ;;  %v121_v20 = vmul.f32 %v570_v14, %v112_v18  ;;  %v182_v21 = vsel %vm180_vm1, %v174_v16, 0 }
  0xa7   :  { %369 = vmatpush3.bf16.msra.mxu0 %v182_v21  ;;  %v268_v21 = vld [vmem:[%s623_s3] sm:$0xf]  ;;  %s515_s3 = smov [#allocation8]  }
  0xa8   :  { %v162_v25 = vrot.slane %v121_v20, 4  ;;  %370 = vmatprep.subr.bf16.mxu0 %v506_v0  ;;  %v171_v31 = vsel %vm167_vm2, %v132_v19, %v165_v24  ;;  %s338_s15 = sshll.u32 %s515_s3, 4  ;;  %s339_s15 = int_to_ptr.vmem [resolvable:$true] %s338_s15 }
  0xa9   :  { %v101_v26 = vpop.permute.xlu1 %100  ;;  %v79_v27 = vpop.permute.xlu0 %78  ;;  %s473_s16 = scalar_lea.vmem %s339_s15, 128  ;;  %p478_p2 = scmp.lt.s32.totalorder %s339_s15, %s339_s15 }
  0xaa   :  { %v110_v28 = vmul.f32 %v575_v22, %v101_v26  ;;  %v88_v29 = vmul.f32 %v577_v23, %v79_v27  ;;  %v170_v30 = vsel %vm167_vm2, %v67_v7, %v162_v25  ;;  %p474_p1 = scmp.ne.s32.totalorder %s339_s15, %s473_s16  ;;  %p479_p3 = scmp.lt.s32.totalorder %s473_s16, %s473_s16 }
  0xab   :  { %v173_v33 = vpack.c.bf16 %v171_v31, %v170_v30 }
  0xac   :  { %v159_v37 = vrot.slane %v110_v28, 4  ;;  %v156_v38 = vrot.slane %v88_v29, 4  ;;  %p480_p4 = por %p479_p3, %p478_p2 }
  0xad   :  { %v90_v35 = vpop.permute.xlu1 %89  ;;  %371 = vmatpush3.bf16.msra.mxu0 %v173_v33  ;;  %v69_v36 = vpop.permute.xlu0 %68 }
  0xae   :  { %v99_v39 = vmul.f32 %v584_v32, %v90_v35  ;;  %v77_v40 = vmul.f32 %v586_v34, %v69_v36  ;;  %372 = vmatprep.subr.bf16.mxu0 %v506_v0  ;;  %p481_p5 = pnand %p480_p4, %p474_p1 }
  0xb0   :  { %v168_v41 = vsel %vm167_vm2, %v77_v40, %v156_v38  ;;  %v169_v42 = vsel %vm167_vm2, %v99_v39, %v159_v37 }
  0xb1   :  { %v172_v43 = vpack.c.bf16 %v169_v42, %v168_v41 }
  0xb3   :  { %373 = vmatpush3.bf16.msra.mxu0 %v172_v43 }
  0xb6   :  { %375 = vmatmul.mubr.msk.bf16.vlgmr.msra.gmra.mxu0 %vm176_vm3, %v175_v44 }
 0x176   :  { %v218_v45 = vpop.f32.mrf.mxu0 }
 0x177   :  { %224 = vadd.xlane.f32.xlu0 %v218_v45  ;;  %v227_v46 = vmul.f32 %v218_v45, %v218_v45 }
 0x178   :  { %v376_v47 = vpop.f32.mrf.mxu0 }
 0x179   :  { %228 = vadd.xlane.f32.xlu1 %v227_v46 }
 0x17a   :  { %v221_v48 = vpop.f32.mrf.mxu0 }
 0x17c   :  { %v377_v49 = vpop.f32.mrf.mxu0 }
 0x200   :  { %v225_v50 = vpop.xlane.xlu0 %224 }
 0x201   :  { %v226_v51 = vmul.f32 0.0078125, %v225_v50 }
 0x202   :  { %v229_v52 = vpop.xlane.xlu1 %228 }
 0x203   :  { %v231_v53 = vmul.f32 %v226_v51, %v226_v51  ;;  %v230_v54 = vmul.f32 0.0078125, %v229_v52  ;;  %v234_v58 = vsub.f32 %v218_v45, %v226_v51 }
 0x205   :  { %v232_v55 = vsub.f32 %v230_v54, %v231_v53 }
 0x207   :  { %v233_v56 = vmax.f32 %v232_v55, 0.0 }
 0x209   :  { %v235_v57 = vadd.f32 1e-05, %v233_v56 }
 0x20b   :  { %409 = vrsqrt.f32 %v235_v57 }
 0x218   :  { %v410_v59 = vpop.eup %409 }
 0x219   :  { %v237_v60 = vmul.f32 %v410_v59, %v234_v58 }
 0x21b   :  { %v238_v61 = vmax.f32 %v237_v60, 0.0 }
 0x21d   :  { %254 = vrot.lane.b32.xlu1 %v238_v61, %s509_s8  ;;  %260 = vrot.lane.b32.xlu0 %v238_v61, %s508_s2 }
 0x221   :  { %251 = vrot.lane.b32.xlu1 %v238_v61, %s510_s9  ;;  %257 = vrot.lane.b32.xlu0 %v238_v61, %s507_s0 }
 0x225   :  { %248 = vrot.lane.b32.xlu1 %v238_v61, %s501_s20  ;;  %245 = vrot.lane.b32.xlu0 %v238_v61, %s513_s11 }
 0x229   :  { %242 = vrot.lane.b32.xlu1 %v238_v61, %s512_s10  ;;  %239 = vrot.lane.b32.xlu0 %v238_v61, %s514_s12 }
 0x28f   :  { %v255_v62 = vpop.permute.xlu1 %254  ;;  %v261_v63 = vpop.permute.xlu0 %260 }
 0x290   :  { %v262_v1 = vmul.f32 %v563_v8, %v261_v63  ;;  %v256_v5 = vmul.f32 %v568_v13, %v255_v62 }
 0x292   :  { %v267_v2 = vpack.c.bf16 %v262_v1, %v262_v1 }
 0x293   :  { %v252_v3 = vpop.permute.xlu1 %251  ;;  %v258_v4 = vpop.permute.xlu0 %257 }
 0x294   :  { %v259_v6 = vmul.f32 %v565_v9, %v258_v4  ;;  %v274_v7 = vsel %vm167_vm2, %v267_v2, 0  ;;  %v253_v11 = vmul.f32 %v570_v14, %v252_v3 }
 0x295   :  { %379 = vmatpush3.bf16.msra.mxu1 %v274_v7 }
 0x296   :  { %v266_v10 = vpack.c.bf16 %v259_v6, %v256_v5  ;;  %380 = vmatprep.subr.bf16.mxu1 %v506_v0  ;;  %v265_v8 = vpack.c.bf16 %v253_v11, %v238_v61 }
 0x297   :  { %v249_v12 = vpop.permute.xlu1 %248  ;;  %v246_v15 = vpop.permute.xlu0 %245 }
 0x298   :  { %v250_v16 = vmul.f32 %v575_v22, %v249_v12  ;;  %v247_v13 = vmul.f32 %v584_v32, %v246_v15 }
 0x299   :  { %381 = vmatpush3.bf16.msra.mxu1 %v266_v10 }
 0x29a   :  { %382 = vmatprep.subr.bf16.mxu1 %v506_v0  ;;  %v264_v18 = vpack.c.bf16 %v250_v16, %v247_v13 }
 0x29b   :  { %v243_v17 = vpop.permute.xlu1 %242  ;;  %v240_v9 = vpop.permute.xlu0 %239 }
 0x29c   :  { %v244_v19 = vmul.f32 %v577_v23, %v243_v17  ;;  %v241_v14 = vmul.f32 %v586_v34, %v240_v9 }
 0x29d   :  { %383 = vmatpush3.bf16.msra.mxu1 %v265_v8 }
 0x29e   :  { %384 = vmatprep.subr.bf16.mxu1 %v506_v0  ;;  %v263_v20 = vpack.c.bf16 %v244_v19, %v241_v14 }
 0x2a1   :  { %385 = vmatpush3.bf16.msra.mxu1 %v264_v18 }
 0x2a2   :  { %386 = vmatprep.subr.bf16.mxu1 %v506_v0 }
 0x2a5   :  { %387 = vmatpush3.bf16.msra.mxu1 %v263_v20 }
 0x2a8   :  { %389 = vmatmul.mubr.msk.bf16.vlgmr.msra.gmra.mxu1 %vm269_vm4, %v268_v21 }
 0x368   :  { %v310_v22 = vpop.f32.mrf.mxu1 }
 0x369   :  { %316 = vadd.xlane.f32.xlu0 %v310_v22  ;;  %v319_v24 = vmul.f32 %v310_v22, %v310_v22 }
 0x36a   :  { %v390_v25 = vpop.f32.mrf.mxu1 }
 0x36b   :  { %320 = vadd.xlane.f32.xlu1 %v319_v24 }
 0x36c   :  { %v313_v26 = vpop.f32.mrf.mxu1 }
 0x36e   :  { %v391_v23 = vpop.f32.mrf.mxu1 }
 0x3f2   :  { %v317_v27 = vpop.xlane.xlu0 %316 }
 0x3f3   :  { %v318_v28 = vmul.f32 0.0078125, %v317_v27 }
 0x3f4   :  { %v321_v29 = vpop.xlane.xlu1 %320 }
 0x3f5   :  { %v323_v30 = vmul.f32 %v318_v28, %v318_v28  ;;  %v322_v0 = vmul.f32 0.0078125, %v321_v29  ;;  %v326_v34 = vsub.f32 %v310_v22, %v318_v28 }
 0x3f7   :  { %v324_v31 = vsub.f32 %v322_v0, %v323_v30 }
 0x3f9   :  { %v325_v32 = vmax.f32 %v324_v31, 0.0 }
 0x3fb   :  { %v327_v33 = vadd.f32 1e-05, %v325_v32 }
 0x3fd   :  { %411 = vrsqrt.f32 %v327_v33 }
 0x40a   :  { %v412_v35 = vpop.eup %411 }
 0x40b   :  { %v329_v36 = vmul.f32 %v412_v35, %v326_v34 }
 0x40d   :  { %v330_v37 = vmax.f32 %v329_v36, 0.0 }
 0x40f   :  { %331 = vst [vmem:[#allocation8] sm:$0xff] %v330_v37 }
 0x410   :  { %484 = shalt.err (!%p481_p5)
}
 0x411   :  { %341 = dma.vmem_to_hbm [thread:$0]  %s339_s15, 128, %s624_s4, [#allocation4]  }
 0x412   :  { %497 = dma.done.wait [#allocation4], 128  }
 0x413   :  { %498 = vsyncadd [#allocation4], 4294967168 }
 0x414   :  { %345 = vsyncpa [#allocation3], 1 }
 0x415   :  { %346 = vsyncpa [#allocation6], 1 }
 0x416   :  { %347 = vsyncpa [#allocation4], 1 }

</bundles_post_ra>
